<compile_context>
chip_gen: v6e
topology: v6e:2x2x1
jax: 0.10.0
libtpu: 0.0.40
codegen_flags: <defaults>
</compile_context>

<pallas_src>
import jax
import jax.numpy as jnp
from jax import lax
from jax.experimental import pallas as pl
from jax.experimental.pallas import tpu as pltpu

_SUBLANE = 8          # f32 sublane tile
_UNROLL = 8           # bounded unroll of the recurrence loop


def rnn_kernel(x_ref, wih_ref, whh_ref, b_ref, wfc_ref, bfc_ref, out_ref, xw_ref):
    """Whole RNN forward in one kernel invocation (no time grid).

    x_ref   : (T*Bp, D_in)  time-major flattened input (row t*Bp + b)
    wih_ref : (D_in, H)     W_ih^T
    whh_ref : (H, H)        W_hh^T
    b_ref   : (1, H)        b_ih + b_hh (pre-added in wrapper)
    wfc_ref : (H, C)        W_fc^T
    bfc_ref : (1, C)        b_fc
    out_ref : (Bp, C)       log-softmax output (padded batch)
    xw_ref  : (T*Bp, H)     VMEM scratch: hoisted input projection
    """
    TB = x_ref.shape[0]
    Bp = out_ref.shape[0]          # padded batch, multiple of the sublane tile
    T = TB // Bp
    H = whh_ref.shape[0]

    # Hoisted input projection + fused bias: one MXU pass covers all timesteps.
    xw_ref[...] = (
        jnp.dot(x_ref[...], wih_ref[...], preferred_element_type=jnp.float32)
        + b_ref[...]
    )

    # Hoist the recurrent weight out of the serial loop: no per-step vld of
    # W_hh on the latency-bound dependency chain.
    whh = whh_ref[...]

    def step(t, h):
        # Bp is a multiple of 8 -> each slice is a clean whole-tile load.
        start = pl.multiple_of(t * Bp, Bp)
        xw_t = xw_ref[pl.ds(start, Bp), :]                      # (Bp, H)
        return jnp.tanh(
            xw_t + jnp.dot(h, whh, preferred_element_type=jnp.float32)
        )

    h_last = lax.fori_loop(
        0, T, step, jnp.zeros((Bp, H), jnp.float32), unroll=_UNROLL
    )

    # fc + LogSoftmax epilogue: runs exactly once, off the recurrence path.
    logits = (jnp.dot(h_last, wfc_ref[...], preferred_element_type=jnp.float32)
              + bfc_ref[...])                                   # (Bp, C)
    m = jnp.max(logits, axis=1, keepdims=True)
    shifted = logits - m
    lse = jnp.log(jnp.sum(jnp.exp(shifted), axis=1, keepdims=True))
    out_ref[...] = shifted - lse                                # LogSoftmax(dim=1)


def rnn_forward(inputs, params):
    """inputs: (T, B, D_in) float32.  Returns (B, num_classes) log-probabilities."""
    T, B, D_in = inputs.shape
    H = params["w_hh"].shape[0]
    C = params["w_fc"].shape[0]

    # Pad batch to the f32 sublane tile so per-step slices are aligned.
    B_pad = max(_SUBLANE, ((B + _SUBLANE - 1) // _SUBLANE) * _SUBLANE)
    if B_pad != B:
        pad = jnp.zeros((T, B_pad - B, D_in), inputs.dtype)
        inputs_p = jnp.concatenate([inputs, pad], axis=1)
    else:
        inputs_p = inputs

    x_flat = inputs_p.reshape(T * B_pad, D_in)    # time-major rows: t*B_pad + b
    wih_t = params["w_ih"].T                      # (D_in, H)
    whh_t = params["w_hh"].T                      # (H, H)
    b = (params["b_ih"] + params["b_hh"]).reshape(1, H)
    wfc_t = params["w_fc"].T                      # (H, C)
    bfc = params["b_fc"].reshape(1, C)

    # Scoped-VMEM budget: inputs + scratch + weights + output, double-buffer
    # margin + 4 MiB headroom.  (Default scoped limits are 16/32 MiB.)
    working_set = 4 * (x_flat.size + T * B_pad * H + wih_t.size + whh_t.size
                       + wfc_t.size + b.size + bfc.size + B_pad * C)
    vmem_bytes = int(min(2 * working_set + (4 << 20), 100 << 20))

    cost = pl.CostEstimate(
        flops=2 * T * B_pad * (D_in * H + H * H) + 2 * B_pad * H * C,
        transcendentals=T * B_pad * H + B_pad * C,
        bytes_accessed=4 * (x_flat.size + wih_t.size + whh_t.size
                            + wfc_t.size + B_pad * C),
    )

    in_specs = [pl.BlockSpec(memory_space=pltpu.MemorySpace.VMEM) for _ in range(6)]
    out_spec = pl.BlockSpec(memory_space=pltpu.MemorySpace.VMEM)

    out_p = pl.pallas_call(
        rnn_kernel,
        out_shape=jax.ShapeDtypeStruct((B_pad, C), jnp.float32),
        in_specs=in_specs,
        out_specs=out_spec,
        scratch_shapes=[pltpu.VMEM((T * B_pad, H), jnp.float32)],
        compiler_params=pltpu.CompilerParams(vmem_limit_bytes=vmem_bytes),
        cost_estimate=cost,
    )(x_flat, wih_t, whh_t, b, wfc_t, bfc)

    # TODO(synk): at production T/H, time-chunk with a grid (or emit_pipeline)
    # and bf16 operands so the working set stays under v7x's 64 MiB VMEM.
    return out_p[:B]


def rnn_reference(inputs, params):
    """Pure-JAX reference matching torch semantics."""
    T, B, D_in = inputs.shape
    H = params["w_hh"].shape[0]
    h = jnp.zeros((B, H), jnp.float32)
    for t in range(T):
        h = jnp.tanh(inputs[t] @ params["w_ih"].T + params["b_ih"]
                     + h @ params["w_hh"].T + params["b_hh"])
    logits = h @ params["w_fc"].T + params["b_fc"]
    return jax.nn.log_softmax(logits, axis=1)


if __name__ == "__main__":
    SEQ, BATCH, INPUT_DIM, HIDDEN_DIM, NUM_CLASSES = 8, 2, 16, 32, 5

    key = jax.random.PRNGKey(0)
    ks = jax.random.split(key, 7)
    bound = 1.0 / jnp.sqrt(HIDDEN_DIM)   # matches nn.RNN / nn.Linear uniform init scale
    params = {
        "w_ih": jax.random.uniform(ks[0], (HIDDEN_DIM, INPUT_DIM), jnp.float32, -bound, bound),
        "w_hh": jax.random.uniform(ks[1], (HIDDEN_DIM, HIDDEN_DIM), jnp.float32, -bound, bound),
        "b_ih": jax.random.uniform(ks[2], (HIDDEN_DIM,), jnp.float32, -bound, bound),
        "b_hh": jax.random.uniform(ks[3], (HIDDEN_DIM,), jnp.float32, -bound, bound),
        "w_fc": jax.random.uniform(ks[4], (NUM_CLASSES, HIDDEN_DIM), jnp.float32, -bound, bound),
        "b_fc": jax.random.uniform(ks[5], (NUM_CLASSES,), jnp.float32, -bound, bound),
    }
    inputs = jax.random.normal(ks[6], (SEQ, BATCH, INPUT_DIM), jnp.float32)

    out = jax.block_until_ready(rnn_forward(inputs, params))
    ref = rnn_reference(inputs, params)
    assert out.shape == (BATCH, NUM_CLASSES)
    assert jnp.allclose(out, ref, atol=1e-5, rtol=1e-5), (out, ref)
    print("KERNEL_OK")
</pallas_src>

<mosaic_0001>
module attributes {stable_mosaic.version = 11 : i64} {
  func.func @rnn_kernel(%arg0: memref<64x16xf32, #tpu.memory_space<vmem>>, %arg1: memref<16x32xf32, #tpu.memory_space<vmem>>, %arg2: memref<32x32xf32, #tpu.memory_space<vmem>>, %arg3: memref<1x32xf32, #tpu.memory_space<vmem>>, %arg4: memref<32x5xf32, #tpu.memory_space<vmem>>, %arg5: memref<1x5xf32, #tpu.memory_space<vmem>>, %arg6: memref<8x5xf32, #tpu.memory_space<vmem>>, %arg7: memref<64x32xf32, #tpu.memory_space<vmem>>) attributes {dimension_semantics = [], scalar_prefetch = 0 : i64, scratch_operands = 1 : i64, tpu.core_type = #tpu.core_type<tc>} {
    %c0 = arith.constant 0 : index
    %c0_0 = arith.constant 0 : index
    %0 = vector.load %arg0[%c0, %c0_0] : memref<64x16xf32, #tpu.memory_space<vmem>>, vector<64x16xf32>
    %c0_1 = arith.constant 0 : index
    %c0_2 = arith.constant 0 : index
    %1 = vector.load %arg1[%c0_1, %c0_2] : memref<16x32xf32, #tpu.memory_space<vmem>>, vector<16x32xf32>
    %cst = arith.constant dense<0.000000e+00> : vector<64x32xf32>
    %2 = tpu.matmul %0, %1, %cst {dimension_numbers = #tpu.dot_dimension_numbers<[1], [0], [0], [1], [0, 0, 1, 1], [], []>} : vector<64x16xf32>, vector<16x32xf32>, vector<64x32xf32> -> vector<64x32xf32>
    %c0_3 = arith.constant 0 : index
    %c0_4 = arith.constant 0 : index
    %3 = vector.load %arg3[%c0_3, %c0_4] : memref<1x32xf32, #tpu.memory_space<vmem>>, vector<1x32xf32>
    %4 = vector.broadcast %3 : vector<1x32xf32> to vector<64x32xf32>
    %5 = arith.addf %2, %4 : vector<64x32xf32>
    %c0_5 = arith.constant 0 : index
    %c0_6 = arith.constant 0 : index
    %6 = vector.load %arg7[%c0_5, %c0_6] : memref<64x32xf32, #tpu.memory_space<vmem>>, vector<64x32xf32>
    tpu.vector_store %arg7[%c0_5, %c0_6], %5 {strides = array<i32>} : memref<64x32xf32, #tpu.memory_space<vmem>>, vector<64x32xf32>,
    %c0_7 = arith.constant 0 : index
    %c0_8 = arith.constant 0 : index
    %7 = vector.load %arg2[%c0_7, %c0_8] : memref<32x32xf32, #tpu.memory_space<vmem>>, vector<32x32xf32>
    %cst_9 = arith.constant 0.000000e+00 : f32
    %8 = vector.broadcast %cst_9 : f32 to vector<8x32xf32>
    %c0_i32 = arith.constant 0 : i32
    %c8_i32 = arith.constant 8 : i32
    %9 = arith.muli %c0_i32, %c8_i32 : i32
    %10 = tpu.assume_multiple %9, 8 : i32
    %11 = arith.index_cast %10 : i32 to index
    %c0_10 = arith.constant 0 : index
    %12 = vector.load %arg7[%11, %c0_10] : memref<64x32xf32, #tpu.memory_space<vmem>>, vector<8x32xf32>
    %cst_11 = arith.constant dense<0.000000e+00> : vector<8x32xf32>
    %13 = tpu.matmul %8, %7, %cst_11 {dimension_numbers = #tpu.dot_dimension_numbers<[1], [0], [0], [1], [0, 0, 1, 1], [], []>} : vector<8x32xf32>, vector<32x32xf32>, vector<8x32xf32> -> vector<8x32xf32>
    %14 = arith.addf %12, %13 : vector<8x32xf32>
    %15 = math.tanh %14 : vector<8x32xf32>
    %c1_i32 = arith.constant 1 : i32
    %c8_i32_12 = arith.constant 8 : i32
    %16 = arith.muli %c1_i32, %c8_i32_12 : i32
    %17 = tpu.assume_multiple %16, 8 : i32
    %18 = arith.index_cast %17 : i32 to index
    %c0_13 = arith.constant 0 : index
    %19 = vector.load %arg7[%18, %c0_13] : memref<64x32xf32, #tpu.memory_space<vmem>>, vector<8x32xf32>
    %cst_14 = arith.constant dense<0.000000e+00> : vector<8x32xf32>
    %20 = tpu.matmul %15, %7, %cst_14 {dimension_numbers = #tpu.dot_dimension_numbers<[1], [0], [0], [1], [0, 0, 1, 1], [], []>} : vector<8x32xf32>, vector<32x32xf32>, vector<8x32xf32> -> vector<8x32xf32>
    %21 = arith.addf %19, %20 : vector<8x32xf32>
    %22 = math.tanh %21 : vector<8x32xf32>
    %c2_i32 = arith.constant 2 : i32
    %c8_i32_15 = arith.constant 8 : i32
    %23 = arith.muli %c2_i32, %c8_i32_15 : i32
    %24 = tpu.assume_multiple %23, 8 : i32
    %25 = arith.index_cast %24 : i32 to index
    %c0_16 = arith.constant 0 : index
    %26 = vector.load %arg7[%25, %c0_16] : memref<64x32xf32, #tpu.memory_space<vmem>>, vector<8x32xf32>
    %cst_17 = arith.constant dense<0.000000e+00> : vector<8x32xf32>
    %27 = tpu.matmul %22, %7, %cst_17 {dimension_numbers = #tpu.dot_dimension_numbers<[1], [0], [0], [1], [0, 0, 1, 1], [], []>} : vector<8x32xf32>, vector<32x32xf32>, vector<8x32xf32> -> vector<8x32xf32>
    %28 = arith.addf %26, %27 : vector<8x32xf32>
    %29 = math.tanh %28 : vector<8x32xf32>
    %c3_i32 = arith.constant 3 : i32
    %c8_i32_18 = arith.constant 8 : i32
    %30 = arith.muli %c3_i32, %c8_i32_18 : i32
    %31 = tpu.assume_multiple %30, 8 : i32
    %32 = arith.index_cast %31 : i32 to index
    %c0_19 = arith.constant 0 : index
    %33 = vector.load %arg7[%32, %c0_19] : memref<64x32xf32, #tpu.memory_space<vmem>>, vector<8x32xf32>
    %cst_20 = arith.constant dense<0.000000e+00> : vector<8x32xf32>
    %34 = tpu.matmul %29, %7, %cst_20 {dimension_numbers = #tpu.dot_dimension_numbers<[1], [0], [0], [1], [0, 0, 1, 1], [], []>} : vector<8x32xf32>, vector<32x32xf32>, vector<8x32xf32> -> vector<8x32xf32>
    %35 = arith.addf %33, %34 : vector<8x32xf32>
    %36 = math.tanh %35 : vector<8x32xf32>
    %c4_i32 = arith.constant 4 : i32
    %c8_i32_21 = arith.constant 8 : i32
    %37 = arith.muli %c4_i32, %c8_i32_21 : i32
    %38 = tpu.assume_multiple %37, 8 : i32
    %39 = arith.index_cast %38 : i32 to index
    %c0_22 = arith.constant 0 : index
    %40 = vector.load %arg7[%39, %c0_22] : memref<64x32xf32, #tpu.memory_space<vmem>>, vector<8x32xf32>
    %cst_23 = arith.constant dense<0.000000e+00> : vector<8x32xf32>
    %41 = tpu.matmul %36, %7, %cst_23 {dimension_numbers = #tpu.dot_dimension_numbers<[1], [0], [0], [1], [0, 0, 1, 1], [], []>} : vector<8x32xf32>, vector<32x32xf32>, vector<8x32xf32> -> vector<8x32xf32>
    %42 = arith.addf %40, %41 : vector<8x32xf32>
    %43 = math.tanh %42 : vector<8x32xf32>
    %c5_i32 = arith.constant 5 : i32
    %c8_i32_24 = arith.constant 8 : i32
    %44 = arith.muli %c5_i32, %c8_i32_24 : i32
    %45 = tpu.assume_multiple %44, 8 : i32
    %46 = arith.index_cast %45 : i32 to index
    %c0_25 = arith.constant 0 : index
    %47 = vector.load %arg7[%46, %c0_25] : memref<64x32xf32, #tpu.memory_space<vmem>>, vector<8x32xf32>
    %cst_26 = arith.constant dense<0.000000e+00> : vector<8x32xf32>
    %48 = tpu.matmul %43, %7, %cst_26 {dimension_numbers = #tpu.dot_dimension_numbers<[1], [0], [0], [1], [0, 0, 1, 1], [], []>} : vector<8x32xf32>, vector<32x32xf32>, vector<8x32xf32> -> vector<8x32xf32>
    %49 = arith.addf %47, %48 : vector<8x32xf32>
    %50 = math.tanh %49 : vector<8x32xf32>
    %c6_i32 = arith.constant 6 : i32
    %c8_i32_27 = arith.constant 8 : i32
    %51 = arith.muli %c6_i32, %c8_i32_27 : i32
    %52 = tpu.assume_multiple %51, 8 : i32
    %53 = arith.index_cast %52 : i32 to index
    %c0_28 = arith.constant 0 : index
    %54 = vector.load %arg7[%53, %c0_28] : memref<64x32xf32, #tpu.memory_space<vmem>>, vector<8x32xf32>
    %cst_29 = arith.constant dense<0.000000e+00> : vector<8x32xf32>
    %55 = tpu.matmul %50, %7, %cst_29 {dimension_numbers = #tpu.dot_dimension_numbers<[1], [0], [0], [1], [0, 0, 1, 1], [], []>} : vector<8x32xf32>, vector<32x32xf32>, vector<8x32xf32> -> vector<8x32xf32>
    %56 = arith.addf %54, %55 : vector<8x32xf32>
    %57 = math.tanh %56 : vector<8x32xf32>
    %c7_i32 = arith.constant 7 : i32
    %c8_i32_30 = arith.constant 8 : i32
    %58 = arith.muli %c7_i32, %c8_i32_30 : i32
    %59 = tpu.assume_multiple %58, 8 : i32
    %60 = arith.index_cast %59 : i32 to index
    %c0_31 = arith.constant 0 : index
    %61 = vector.load %arg7[%60, %c0_31] : memref<64x32xf32, #tpu.memory_space<vmem>>, vector<8x32xf32>
    %cst_32 = arith.constant dense<0.000000e+00> : vector<8x32xf32>
    %62 = tpu.matmul %57, %7, %cst_32 {dimension_numbers = #tpu.dot_dimension_numbers<[1], [0], [0], [1], [0, 0, 1, 1], [], []>} : vector<8x32xf32>, vector<32x32xf32>, vector<8x32xf32> -> vector<8x32xf32>
    %63 = arith.addf %61, %62 : vector<8x32xf32>
    %64 = math.tanh %63 : vector<8x32xf32>
    %c8_i32_33 = arith.constant 8 : i32
    %c0_34 = arith.constant 0 : index
    %c0_35 = arith.constant 0 : index
    %65 = vector.load %arg4[%c0_34, %c0_35] : memref<32x5xf32, #tpu.memory_space<vmem>>, vector<32x5xf32>
    %cst_36 = arith.constant dense<0.000000e+00> : vector<8x5xf32>
    %66 = tpu.matmul %64, %65, %cst_36 {dimension_numbers = #tpu.dot_dimension_numbers<[1], [0], [0], [1], [0, 0, 1, 1], [], []>} : vector<8x32xf32>, vector<32x5xf32>, vector<8x5xf32> -> vector<8x5xf32>
    %c0_37 = arith.constant 0 : index
    %c0_38 = arith.constant 0 : index
    %67 = vector.load %arg5[%c0_37, %c0_38] : memref<1x5xf32, #tpu.memory_space<vmem>>, vector<1x5xf32>
    %68 = vector.broadcast %67 : vector<1x5xf32> to vector<8x5xf32>
    %69 = arith.addf %66, %68 : vector<8x5xf32>
    %cst_39 = arith.constant dense<0xFF800000> : vector<8xf32>
    %70 = vector.multi_reduction <maximumf>, %69, %cst_39 [1] : vector<8x5xf32> to vector<8xf32>
    %71 = vector.shape_cast %70 : vector<8xf32> to vector<8x1xf32>
    %72 = vector.broadcast %71 : vector<8x1xf32> to vector<8x5xf32>
    %73 = arith.subf %69, %72 : vector<8x5xf32>
    %74 = math.exp %73 : vector<8x5xf32>
    %cst_40 = arith.constant dense<0.000000e+00> : vector<8xf32>
    %75 = vector.multi_reduction <add>, %74, %cst_40 [1] : vector<8x5xf32> to vector<8xf32>
    %76 = vector.shape_cast %75 : vector<8xf32> to vector<8x1xf32>
    %77 = math.log %76 : vector<8x1xf32>
    %78 = vector.broadcast %77 : vector<8x1xf32> to vector<8x5xf32>
    %79 = arith.subf %73, %78 : vector<8x5xf32>
    %c0_41 = arith.constant 0 : index
    %c0_42 = arith.constant 0 : index
    %80 = vector.load %arg6[%c0_41, %c0_42] : memref<8x5xf32, #tpu.memory_space<vmem>>, vector<8x5xf32>
    tpu.vector_store %arg6[%c0_41, %c0_42], %79 {strides = array<i32>} : memref<8x5xf32, #tpu.memory_space<vmem>>, vector<8x5xf32>,
    return
  }
}

</mosaic_0001>

<bundles_post_ra>
// kernel: tpu_custom_call.1
= control target key start
LH: loop header
LB: loop body
LE: loop exit
PB: predicated region body
PF: predicated region fallthrough
CT: control target
= control target key end

     0   :  { %vm41_vm0 = vcmask 130048   ;;  %v1144_v5 = vmov 0.0   ;;  %s1377_s0 = inlined_call_operand.vmem [shape: f32[64,16], index: 0, kind: input, shape index: {}]   ;;  %s1378_s1 = inlined_call_operand.vmem [shape: f32[16,32], index: 1, kind: input, shape index: {}]   ;;  %s1379_s2 = inlined_call_operand.vmem [shape: f32[32,32], index: 2, kind: input, shape index: {}]   ;;  %s1380_s3 = inlined_call_operand.vmem [shape: f32[1,32], index: 3, kind: input, shape index: {}]   ;;  %s1381_s4 = inlined_call_operand.vmem [shape: f32[32,5], index: 4, kind: input, shape index: {}]   ;;  %s1382_s5 = inlined_call_operand.vmem [shape: f32[1,5], index: 5, kind: input, shape index: {}]   ;;  %s1383_s6 = inlined_call_operand.hbm [shape: f32[8,5], index: 6, kind: output, shape index: {}]  }
   0x1   :  { %v33_v0 = vld [vmem:[%s1378_s1 + $0x8] sm:$0xff]  ;;  %v32_v1 = vld [vmem:[%s1378_s1] sm:$0xff]  ;;  %v1195_v3 = vld [vmem:[%s1379_s2 + $0x18] sm:$0xff]  ;;  %1000 = vmatprep.subr.mxu1 %v1144_v5 }
   0x2   :  { %v24_v2 = vld [vmem:[%s1377_s0] sm:$0xff]  ;;  %984 = vmatprep.subr.mxu0 %v33_v0  ;;  %v25_v4 = vld [vmem:[%s1377_s0 + $0x8] sm:$0xff]  ;;  %v1204_v6 = vld [vmem:[%s1379_s2 + $0x10] sm:$0xff] }
   0x3   :  { %988 = vmatprep.mubr.msk.f32.mxu0 %vm41_vm0, %v24_v2  ;;  %985 = vmatpush3.msra.mxu0 %v33_v0 }
   0x4   :  { %11 = vsyncpa [#allocation4], 0  ;;  %986 = vmatprep.subr.mxu0 %v32_v1  ;;  %1001 = vmatpush3.msra.mxu1 %v1195_v3  ;;  %v1211_v7 = vld [vmem:[%s1379_s2 + $0x8] sm:$0xff]  ;;  %v1219_v8 = vld [vmem:[%s1379_s2] sm:$0xff]  ;;  %vm1145_vm1 = vmmov 0   ;;  %vm171_vm2 = vcmask 261120  }
   0x5   :  { %987 = vmatpush3.msra.mxu0 %v32_v1  ;;  %1002 = vmatprep.subr.mxu1 %v1144_v5  ;;  %v1250_v9 = vld [vmem:[%s1380_s3] ss:$0 sm:$0xff]  ;;  %v26_v19 = vld [vmem:[%s1377_s0 + $0x10] sm:$0xff]  ;;  %v27_v20 = vld [vmem:[%s1377_s0 + $0x18] sm:$0xff]  ;;  %vm883_vm3 = vcmask 39936  }
   0x6   :  { %989 = vmatmul.mubr.msk.f32.vlgmr.msra.gmra.mxu0 %vm41_vm0, %v25_v4  ;;  %1003 = vmatpush3.msra.mxu1 %v1204_v6  ;;  %v28_v21 = vld [vmem:[%s1377_s0 + $0x20] sm:$0xff]  ;;  %v29_v22 = vld [vmem:[%s1377_s0 + $0x28] sm:$0xff]  ;;  %v30_v23 = vld [vmem:[%s1377_s0 + $0x30] sm:$0xff] }
   0x7   :  { %1004 = vmatprep.subr.mxu1 %v1144_v5  ;;  %1008 = vmatprep.mubr.msk.f32.mxu1 %vm1145_vm1, %v1144_v5  ;;  %v31_v24 = vld [vmem:[%s1377_s0 + $0x38] sm:$0xff]  ;;  %v801_v4 = vld [vmem:[%s1381_s4 + $0x10] sm:$0xff] }
   0x8   :  { %1005 = vmatpush3.msra.mxu1 %v1211_v7  ;;  %1022 = vmatprep.subr.mxu0 %v1144_v5 }
   0x9   :  { %1006 = vmatprep.subr.mxu1 %v1144_v5  ;;  %1023 = vmatpush3.msra.mxu0 %v1195_v3 }
   0xa   :  { %1007 = vmatpush3.msra.mxu1 %v1219_v8  ;;  %1024 = vmatprep.subr.mxu0 %v1144_v5 }
   0xb   :  { %1009 = vmatmul.mubr.f32.vlgmr.msra.gmra.mxu1 %v1144_v5  ;;  %1011 = vmatprep.subr.mxu1 %v1144_v5 }
   0xc   :  { %1012 = vmatpush3.msra.mxu1 %v1195_v3  ;;  %1019 = vmatprep.mubr.msk.f32.mxu1 %vm1145_vm1, %v1144_v5 }
   0xd   :  { %1013 = vmatprep.subr.mxu1 %v1144_v5  ;;  %1025 = vmatpush3.msra.mxu0 %v1204_v6 }
   0xe   :  { %1014 = vmatpush3.msra.mxu1 %v1204_v6  ;;  %1026 = vmatprep.subr.mxu0 %v1144_v5 }
   0xf   :  { %1015 = vmatprep.subr.mxu1 %v1144_v5  ;;  %1027 = vmatpush3.msra.mxu0 %v1211_v7 }
  0x10   :  { %1016 = vmatpush3.msra.mxu1 %v1211_v7  ;;  %1028 = vmatprep.subr.mxu0 %v1144_v5 }
  0x11   :  { %1017 = vmatprep.subr.mxu1 %v1144_v5  ;;  %1029 = vmatpush3.msra.mxu0 %v1219_v8 }
  0x12   :  { %1018 = vmatpush3.msra.mxu1 %v1219_v8  ;;  %1044 = vmatprep.subr.mxu0 %v1144_v5 }
  0x13   :  { %1033 = vmatprep.subr.mxu1 %v1144_v5  ;;  %991 = vmatprep.mubr.msk.f32.mxu0 %vm41_vm0, %v26_v19 }
  0x14   :  { %992 = vmatmul.mubr.msk.f32.gmra.mxu0 %vm41_vm0, %v27_v20 }
  0x15   :  { %994 = vmatprep.mubr.msk.f32.mxu0 %vm41_vm0, %v28_v21 }
  0x18   :  { %995 = vmatmul.mubr.msk.f32.gmra.mxu0 %vm41_vm0, %v29_v22 }
  0x19   :  { %997 = vmatprep.mubr.msk.f32.mxu0 %vm41_vm0, %v30_v23 }
  0x1c   :  { %998 = vmatmul.mubr.msk.f32.gmra.mxu0 %vm41_vm0, %v31_v24 }
  0x1d   :  { %1030 = vmatprep.mubr.msk.f32.mxu0 %vm1145_vm1, %v1144_v5 }
  0xc6   :  { %v990_v10 = vpop.f32.mrf.mxu0 }
  0xc7   :  { %v138_v11 = vadd.f32 %v990_v10, %v1250_v9 }
  0xc8   :  { %v132_v12 = vpop.f32.mrf.mxu0 }
  0xc9   :  { %173 = vst.msk [vmem:[#allocation2 + $0x8] sm:$0xff] %vm171_vm2, %v138_v11  ;;  %v133_v13 = vadd.f32 %v1250_v9, %v132_v12 }
  0xcb   :  { %172 = vst.msk [vmem:[#allocation2] sm:$0xff] %vm171_vm2, %v133_v13  ;;  %v254_v14 = vpop.f32.mrf.mxu1  ;;  %v927_v13 = vld [vmem:[%s1382_s5] ss:$0 sm:$0xff] }
  0xcd   :  { %v1010_v15 = vpop.f32.mrf.mxu1 }
  0xd0   :  { %v261_v25 = vld [vmem:[#allocation2 + $0x8] sm:$0xff] }
  0xd2   :  { %v184_v16 = vld [vmem:[#allocation2] sm:$0xff] }
  0xd3   :  { %v258_v17 = vadd.f32 %v254_v14, %v184_v16 }
  0xd4   :  { %v993_v30 = vpop.f32.mrf.mxu0 }
  0xd5   :  { %1102 = vtanh.f32 %v258_v17  ;;  %v148_v31 = vadd.f32 %v993_v30, %v1250_v9 }
  0xd6   :  { %v142_v32 = vpop.f32.mrf.mxu0 }
  0xd7   :  { %175 = vst.msk [vmem:[#allocation2 + $0x18] sm:$0xff] %vm171_vm2, %v148_v31  ;;  %v143_v33 = vadd.f32 %v1250_v9, %v142_v32 }
  0xd8   :  { %v996_v34 = vpop.f32.mrf.mxu0 }
  0xd9   :  { %174 = vst.msk [vmem:[#allocation2 + $0x10] sm:$0xff] %vm171_vm2, %v143_v33  ;;  %v158_v35 = vadd.f32 %v996_v34, %v1250_v9 }
  0xda   :  { %v152_v36 = vpop.f32.mrf.mxu0 }
  0xdb   :  { %177 = vst.msk [vmem:[#allocation2 + $0x28] sm:$0xff] %vm171_vm2, %v158_v35  ;;  %v153_v37 = vadd.f32 %v1250_v9, %v152_v36 }
  0xdc   :  { %v999_v38 = vpop.f32.mrf.mxu0 }
  0xdd   :  { %176 = vst.msk [vmem:[#allocation2 + $0x20] sm:$0xff] %vm171_vm2, %v153_v37  ;;  %v168_v39 = vadd.f32 %v999_v38, %v1250_v9 }
  0xde   :  { %v162_v40 = vpop.f32.mrf.mxu0  ;;  %v415_v47 = vld [vmem:[#allocation2 + $0x18] sm:$0xff] }
  0xdf   :  { %179 = vst.msk [vmem:[#allocation2 + $0x38] sm:$0xff] %vm171_vm2, %v168_v39  ;;  %v163_v41 = vadd.f32 %v1250_v9, %v162_v40 }
  0xe0   :  { %v338_v42 = vld [vmem:[#allocation2 + $0x10] sm:$0xff] }
  0xe1   :  { %178 = vst.msk [vmem:[#allocation2 + $0x30] sm:$0xff] %vm171_vm2, %v163_v41 }
  0xe2   :  { %v1103_v18 = vpop.eup %1102  ;;  %v569_v57 = vld [vmem:[#allocation2 + $0x28] sm:$0xff] }
  0xe3   :  { %1020 = vmatmul.mubr.msk.f32.vlgmr.msra.gmra.mxu1 %vm171_vm2, %v1103_v18 }
  0xe4   :  { %1034 = vmatpush3.msra.mxu1 %v1195_v3  ;;  %1041 = vmatprep.mubr.msk.f32.mxu1 %vm1145_vm1, %v1144_v5  ;;  %v492_v52 = vld [vmem:[#allocation2 + $0x20] sm:$0xff] }
  0xe5   :  { %1035 = vmatprep.subr.mxu1 %v1144_v5 }
  0xe6   :  { %1036 = vmatpush3.msra.mxu1 %v1204_v6 }
  0xe7   :  { %1037 = vmatprep.subr.mxu1 %v1144_v5 }
  0xe8   :  { %1038 = vmatpush3.msra.mxu1 %v1211_v7  ;;  %v646_v62 = vld [vmem:[#allocation2 + $0x30] sm:$0xff] }
  0xe9   :  { %1039 = vmatprep.subr.mxu1 %v1144_v5 }
  0xea   :  { %1040 = vmatpush3.msra.mxu1 %v1219_v8 }
  0xeb   :  { %1055 = vmatprep.subr.mxu1 %v1144_v5 }
 0x1a3   :  { %v331_v26 = vpop.f32.mrf.mxu1 }
 0x1a4   :  { %v335_v27 = vadd.f32 %v331_v26, %v261_v25 }
 0x1a5   :  { %v1021_v28 = vpop.f32.mrf.mxu1 }
 0x1a6   :  { %1104 = vtanh.f32 %v335_v27 }
 0x1b3   :  { %v1105_v29 = vpop.eup %1104 }
 0x1b4   :  { %1031 = vmatmul.mubr.msk.f32.vlgmr.msra.gmra.mxu0 %vm171_vm2, %v1105_v29 }
 0x1b5   :  { %1045 = vmatpush3.msra.mxu0 %v1195_v3  ;;  %1052 = vmatprep.mubr.msk.f32.mxu0 %vm1145_vm1, %v1144_v5 }
 0x1b6   :  { %1046 = vmatprep.subr.mxu0 %v1144_v5 }
 0x1b7   :  { %1047 = vmatpush3.msra.mxu0 %v1204_v6 }
 0x1b8   :  { %1048 = vmatprep.subr.mxu0 %v1144_v5 }
 0x1b9   :  { %1049 = vmatpush3.msra.mxu0 %v1211_v7 }
 0x1ba   :  { %1050 = vmatprep.subr.mxu0 %v1144_v5 }
 0x1bb   :  { %1051 = vmatpush3.msra.mxu0 %v1219_v8 }
 0x1bc   :  { %1066 = vmatprep.subr.mxu0 %v1144_v5 }
 0x274   :  { %v408_v43 = vpop.f32.mrf.mxu0 }
 0x275   :  { %v412_v44 = vadd.f32 %v408_v43, %v338_v42 }
 0x276   :  { %v1032_v45 = vpop.f32.mrf.mxu0 }
 0x277   :  { %1106 = vtanh.f32 %v412_v44 }
 0x284   :  { %v1107_v46 = vpop.eup %1106 }
 0x285   :  { %1042 = vmatmul.mubr.msk.f32.vlgmr.msra.gmra.mxu1 %vm171_vm2, %v1107_v46 }
 0x286   :  { %1056 = vmatpush3.msra.mxu1 %v1195_v3  ;;  %1063 = vmatprep.mubr.msk.f32.mxu1 %vm1145_vm1, %v1144_v5 }
 0x287   :  { %1057 = vmatprep.subr.mxu1 %v1144_v5 }
 0x288   :  { %1058 = vmatpush3.msra.mxu1 %v1204_v6 }
 0x289   :  { %1059 = vmatprep.subr.mxu1 %v1144_v5 }
 0x28a   :  { %1060 = vmatpush3.msra.mxu1 %v1211_v7 }
 0x28b   :  { %1061 = vmatprep.subr.mxu1 %v1144_v5 }
 0x28c   :  { %1062 = vmatpush3.msra.mxu1 %v1219_v8 }
 0x28d   :  { %1077 = vmatprep.subr.mxu1 %v1144_v5 }
 0x345   :  { %v485_v48 = vpop.f32.mrf.mxu1 }
 0x346   :  { %v489_v49 = vadd.f32 %v485_v48, %v415_v47 }
 0x347   :  { %v1043_v50 = vpop.f32.mrf.mxu1 }
 0x348   :  { %1108 = vtanh.f32 %v489_v49 }
 0x355   :  { %v1109_v51 = vpop.eup %1108 }
 0x356   :  { %1053 = vmatmul.mubr.msk.f32.vlgmr.msra.gmra.mxu0 %vm171_vm2, %v1109_v51 }
 0x357   :  { %1067 = vmatpush3.msra.mxu0 %v1195_v3  ;;  %1074 = vmatprep.mubr.msk.f32.mxu0 %vm1145_vm1, %v1144_v5 }
 0x358   :  { %1068 = vmatprep.subr.mxu0 %v1144_v5 }
 0x359   :  { %1069 = vmatpush3.msra.mxu0 %v1204_v6 }
 0x35a   :  { %1070 = vmatprep.subr.mxu0 %v1144_v5 }
 0x35b   :  { %1071 = vmatpush3.msra.mxu0 %v1211_v7 }
 0x35c   :  { %1072 = vmatprep.subr.mxu0 %v1144_v5 }
 0x35d   :  { %1073 = vmatpush3.msra.mxu0 %v1219_v8 }
 0x35e   :  { %1088 = vmatprep.subr.mxu0 %v1144_v5 }
 0x416   :  { %v562_v53 = vpop.f32.mrf.mxu0 }
 0x417   :  { %v566_v54 = vadd.f32 %v562_v53, %v492_v52 }
 0x418   :  { %v1054_v55 = vpop.f32.mrf.mxu0 }
 0x419   :  { %1110 = vtanh.f32 %v566_v54 }
 0x426   :  { %v1111_v56 = vpop.eup %1110 }
 0x427   :  { %1064 = vmatmul.mubr.msk.f32.vlgmr.msra.gmra.mxu1 %vm171_vm2, %v1111_v56 }
 0x428   :  { %1078 = vmatpush3.msra.mxu1 %v1195_v3  ;;  %1085 = vmatprep.mubr.msk.f32.mxu1 %vm1145_vm1, %v1144_v5  ;;  %v802_v3 = vld [vmem:[%s1381_s4 + $0x18] sm:$0xff] }
 0x429   :  { %1079 = vmatprep.subr.mxu1 %v1144_v5 }
 0x42a   :  { %1080 = vmatpush3.msra.mxu1 %v1204_v6  ;;  %v800_v6 = vld [vmem:[%s1381_s4 + $0x8] sm:$0xff] }
 0x42b   :  { %1081 = vmatprep.subr.mxu1 %v1144_v5 }
 0x42c   :  { %1082 = vmatpush3.msra.mxu1 %v1211_v7  ;;  %v799_v7 = vld [vmem:[%s1381_s4] sm:$0xff]  ;;  %s1146_s4 = smov [#allocation3]  }
 0x42d   :  { %1083 = vmatprep.subr.mxu1 %v1144_v5  ;;  %s903_s5 = sshll.u32 %s1146_s4, 4  ;;  %s904_s5 = int_to_ptr.vmem [resolvable:$true] %s903_s5 }
 0x42e   :  { %1084 = vmatpush3.msra.mxu1 %v1219_v8  ;;  %v723_v8 = vld [vmem:[#allocation2 + $0x38] sm:$0xff]  ;;  %s1122_s8 = scalar_lea.vmem %s904_s5, 128  ;;  %p1127_p1 = scmp.lt.s32.totalorder %s904_s5, %s904_s5 }
 0x42f   :  { %p1123_p0 = scmp.ne.s32.totalorder %s904_s5, %s1122_s8  ;;  %p1128_p2 = scmp.lt.s32.totalorder %s1122_s8, %s1122_s8 }
 0x431   :  { %p1129_p3 = por %p1128_p2, %p1127_p1 }
 0x433   :  { %p1130_p4 = pnand %p1129_p3, %p1123_p0 }
 0x4e7   :  { %v639_v58 = vpop.f32.mrf.mxu1 }
 0x4e8   :  { %v643_v59 = vadd.f32 %v639_v58, %v569_v57 }
 0x4e9   :  { %v1065_v60 = vpop.f32.mrf.mxu1 }
 0x4ea   :  { %1112 = vtanh.f32 %v643_v59 }
 0x4f7   :  { %v1113_v61 = vpop.eup %1112 }
 0x4f8   :  { %1075 = vmatmul.mubr.msk.f32.vlgmr.msra.gmra.mxu0 %vm171_vm2, %v1113_v61 }
 0x4f9   :  { %1096 = vmatprep.mubr.msk.f32.mxu0 %vm1145_vm1, %v1144_v5  ;;  %1089 = vmatpush3.msra.mxu0 %v802_v3 }
 0x4fa   :  { %1090 = vmatprep.subr.mxu0 %v1144_v5 }
 0x4fb   :  { %1091 = vmatpush3.msra.mxu0 %v801_v4 }
 0x4fc   :  { %1092 = vmatprep.subr.mxu0 %v1144_v5 }
 0x4fd   :  { %1093 = vmatpush3.msra.mxu0 %v800_v6 }
 0x4fe   :  { %1094 = vmatprep.subr.mxu0 %v1144_v5 }
 0x4ff   :  { %1095 = vmatpush3.msra.mxu0 %v799_v7 }
 0x5b8   :  { %v716_v63 = vpop.f32.mrf.mxu0 }
 0x5b9   :  { %v720_v0 = vadd.f32 %v716_v63, %v646_v62 }
 0x5ba   :  { %v1076_v1 = vpop.f32.mrf.mxu0 }
 0x5bb   :  { %1114 = vtanh.f32 %v720_v0 }
 0x5c8   :  { %v1115_v2 = vpop.eup %1114 }
 0x5c9   :  { %1086 = vmatmul.mubr.msk.f32.vlgmr.msra.gmra.mxu1 %vm171_vm2, %v1115_v2 }
 0x689   :  { %v793_v9 = vpop.f32.mrf.mxu1 }
 0x68a   :  { %v797_v10 = vadd.f32 %v793_v9, %v723_v8 }
 0x68b   :  { %v1087_v11 = vpop.f32.mrf.mxu1 }
 0x68c   :  { %1116 = vtanh.f32 %v797_v10 }
 0x699   :  { %v1117_v12 = vpop.eup %1116 }
 0x69a   :  { %1097 = vmatmul.mubr.msk.f32.vlgmr.msra.gmra.mxu0 %vm171_vm2, %v1117_v12 }
 0x75a   :  { %v879_v14 = vpop.f32.mrf.mxu0 }
 0x75b   :  { %v880_v15 = vadd.f32 %v927_v13, %v879_v14 }
 0x75c   :  { %v1098_v16 = vpop.f32.mrf.mxu0 }
 0x75d   :  { %v884_v17 = vsel %vm883_vm3, %v880_v15, -inf }
 0x75e   :  { %885 = vmax.xlane.f32.xlu0 %v884_v17 }
 0x7e7   :  { %v886_v5 = vpop.xlane.xlu0 %885 }
 0x7e8   :  { %v887_v18 = vsub.f32 %v880_v15, %v886_v5 }
 0x7ea   :  { %v888_v19 = vmul.f32 1.442695, %v887_v18 }
 0x7ec   :  { %1118 = vpow2.f32 %v888_v19 }
 0x7f9   :  { %v1119_v20 = vpop.eup %1118 }
 0x7fa   :  { %v890_v21 = vsel %vm883_vm3, %v1119_v20, 0.0 }
 0x7fb   :  { %891 = vadd.xlane.f32.xlu0 %v890_v21 }
 0x884   :  { %v892_v22 = vpop.xlane.xlu0 %891 }
 0x885   :  { %1120 = vlog2.f32 %v892_v22 }
 0x892   :  { %v1121_v23 = vpop.eup %1120 }
 0x893   :  { %v894_v24 = vmul.f32 0.6931472, %v1121_v23 }
 0x895   :  { %v895_v25 = vsub.f32 %v887_v18, %v894_v24 }
 0x897   :  { %896 = vst.msk [vmem:[#allocation3] sm:$0xff] %vm883_vm3, %v895_v25 }
 0x898   :  { %1133 = shalt.err (!%p1130_p4)
}
 0x899   :  { %906 = dma.vmem_to_hbm [thread:$0]  %s904_s5, 128, %s1383_s6, [#allocation4]  }
 0x89a   :  { %1142 = dma.done.wait [#allocation4], 128  }
 0x89b   :  { %1143 = vsyncadd [#allocation4], 4294967168 }
 0x89c   :  { %910 = vsyncpa [#allocation4], 1 }

</bundles_post_ra>
